<compile_context>
chip_gen: v7x
topology: tpu7x:2x2x1
jax: 0.10.0
libtpu: 0.0.40
codegen_flags: <defaults>
</compile_context>

<pallas_src>
import functools

import jax
import jax.numpy as jnp
from jax.experimental import pallas as pl
from jax.experimental.pallas import tpu as pltpu


def _round_up(x, m):
    return (x + m - 1) // m * m


def _rgcn_kernel(adj_ref, feat_ref, w_ref, loopw_ref, bias_ref, out_ref, *, tm):
    # grid = (dst_tiles, R); the relation axis is the innermost reduction.
    i = pl.program_id(0)
    r = pl.program_id(1)

    @pl.when(r == 0)
    def _():
        # Fold self-loop message + bias into the output-block init (no epilogue matmul).
        # The dst-tile features are a slice of the already-resident full feat block.
        row0 = pl.multiple_of(i * tm, tm)
        feat_tile = feat_ref[pl.ds(row0, tm), :]
        out_ref[...] = (
            jnp.dot(feat_tile, loopw_ref[...], preferred_element_type=jnp.float32)
            + bias_ref[...]
        )

    # (TM, N) @ (N, in) -> (TM, in), then (TM, in) @ (in, out) -> (TM, out).
    # h stays in f32 for the second (small) matmul; only adj/feat/W are bf16-quantized.
    # TODO(synk): when out_feat < in_feat, flip associativity to adj @ (feat @ W_r)
    # (contraction over min(in, out)) once the kernel is MXU-bound.
    h = jnp.dot(adj_ref[...], feat_ref[...], preferred_element_type=jnp.float32)
    out_ref[...] += jnp.dot(h, w_ref[r], preferred_element_type=jnp.float32)

    # TODO(synk): activation / layer_norm / dropout are identity under the module's
    # defaults; apply them on the last relation step here if configured.


def _tpu_defaults():
    """Generation-aware tile size and VMEM limit."""
    kind = jax.devices()[0].device_kind.lower()
    # v5e MXUs are 128x128 (TM=128 already fills a pass); v6e/v7x MXUs are 256-wide.
    tm = 128 if "v5" in kind else 256
    try:
        vmem_cap = pltpu.get_tpu_info().vmem_capacity_bytes
    except Exception:
        vmem_cap = 64 * 1024 * 1024  # conservative fallback (v7x per-TC physical)
    # ~100 MiB on 128 MiB parts (v5e/v6e), ~56 MiB on v7x (64 MiB physical).
    vmem_limit = int(min(100 * 1024 * 1024, vmem_cap - 8 * 1024 * 1024))
    return tm, vmem_limit


def build_relation_adjacency(src, dst, etypes, norm, num_nodes, num_rels, *, tm,
                             dtype=jnp.bfloat16):
    """One-time graph preprocessing: dense per-relation adjacency A_r[dst, src] = sum of
    edge norms, padded to a TM multiple and cast once to the MXU compute dtype.

    Kept OUTSIDE the per-call jitted forward so the dominant HBM stream is not rebuilt
    (read f32 + write padded copy) on every forward call.
    """
    n_pad = _round_up(num_nodes, tm)
    adj = jnp.zeros((num_rels, n_pad, n_pad), jnp.float32)
    adj = adj.at[etypes, dst, src].add(norm[:, 0])  # f32 accumulate, quantize once below
    # TODO(synk): on v7x store/stream the adjacency in fp8 (e4m3) for ~2x fewer HBM bytes.
    # TODO(synk): for realistic sparse graphs, also emit a compacted non-empty
    # (dst_tile, relation) work list here and drive the grid with scalar prefetch
    # (PrefetchScalarGridSpec) so empty adjacency tiles are neither DMA'd nor matmul'd.
    return adj.astype(dtype)


@functools.partial(jax.jit, static_argnames=("num_nodes", "tm", "vmem_limit_bytes"))
def rel_graph_conv(feat, adj_p, weight, loop_w, bias, *, num_nodes, tm=256,
                   vmem_limit_bytes=48 * 1024 * 1024):
    """out = sum_r A_r @ (feat @ W_r) + bias + feat @ loop_w  (RelGraphConv forward)."""
    compute_dtype = jnp.bfloat16  # MXU inputs; accumulation stays f32

    num_rels, n_pad, _ = adj_p.shape
    in_feat = feat.shape[1]
    out_feat = weight.shape[-1]

    # Lane-dense padding: feature dims to multiples of 128 (nodes already padded to TM
    # by the adjacency preprocessing).
    in_pad = _round_up(in_feat, 128)
    out_pad = _round_up(out_feat, 128)

    feat_p = jnp.zeros((n_pad, in_pad), compute_dtype)
    feat_p = feat_p.at[:num_nodes, :in_feat].set(feat.astype(compute_dtype))
    w_p = jnp.zeros((num_rels, in_pad, out_pad), compute_dtype)
    w_p = w_p.at[:, :in_feat, :out_feat].set(weight.astype(compute_dtype))
    lw_p = jnp.zeros((in_pad, out_pad), compute_dtype)
    lw_p = lw_p.at[:in_feat, :out_feat].set(loop_w.astype(compute_dtype))
    b_p = jnp.zeros((1, out_pad), jnp.float32)
    b_p = b_p.at[:, :out_feat].set(bias.astype(jnp.float32))

    grid = (n_pad // tm, num_rels)

    # TODO(synk): for very large graphs (esp. v7x, 64 MiB VMEM) add a third src/K grid
    # axis tiling the adjacency columns + feat rows so VMEM no longer scales with N.
    out_p = pl.pallas_call(
        functools.partial(_rgcn_kernel, tm=tm),
        out_shape=jax.ShapeDtypeStruct((n_pad, out_pad), jnp.float32),
        grid_spec=pltpu.PrefetchScalarGridSpec(
            num_scalar_prefetch=0,
            grid=grid,
            in_specs=[
                # per-relation adjacency tile for this dst block: (TM, N_pad), double-buffered.
                # TODO(synk): pl.Buffered(3) here on v5e/v6e once VMEM headroom is confirmed.
                pl.BlockSpec((pl.Squeezed(), tm, n_pad), lambda i, r: (r, i, 0)),
                # all source features: resident across the grid, single-buffered
                pl.BlockSpec((n_pad, in_pad), lambda i, r: (0, 0),
                             pipeline_mode=pl.Buffered(1)),
                # all relation weights: resident, single-buffered, indexed w_ref[r] in-kernel
                pl.BlockSpec((num_rels, in_pad, out_pad), lambda i, r: (0, 0, 0),
                             pipeline_mode=pl.Buffered(1)),
                # self-loop weight: resident, single-buffered
                pl.BlockSpec((in_pad, out_pad), lambda i, r: (0, 0),
                             pipeline_mode=pl.Buffered(1)),
                # bias: resident, single-buffered
                pl.BlockSpec((1, out_pad), lambda i, r: (0, 0),
                             pipeline_mode=pl.Buffered(1)),
            ],
            out_specs=pl.BlockSpec((tm, out_pad), lambda i, r: (i, 0)),
        ),
        compiler_params=pltpu.CompilerParams(
            # dst tiles are independent (megacore / v7x dual-TC); relations are a reduction.
            dimension_semantics=("parallel", "arbitrary"),
            vmem_limit_bytes=vmem_limit_bytes,
        ),
    )(adj_p, feat_p, w_p, lw_p, b_p)

    return out_p[:num_nodes, :out_feat]


def xavier_uniform(key, shape, gain):
    # matches nn.init.xavier_uniform_ fan computation used by the module (demo init)
    fan_in, fan_out = shape[-2], shape[-1]
    bound = gain * (6.0 / (fan_in + fan_out)) ** 0.5
    return jax.random.uniform(key, shape, jnp.float32, -bound, bound)


if __name__ == "__main__":
    # small shapes (non-multiples of 128 to exercise the padding path)
    N = 200          # number of nodes
    E = 600          # number of edges
    IN_FEAT = 32
    OUT_FEAT = 48
    NUM_RELS = 3
    NUM_BASES = 2    # exercise basis decomposition (num_bases < num_rels)

    key = jax.random.PRNGKey(0)
    k_feat, k_src, k_dst, k_et, k_w, k_comp, k_loop = jax.random.split(key, 7)

    feat = jax.random.normal(k_feat, (N, IN_FEAT), jnp.float32)
    src = jax.random.randint(k_src, (E,), 0, N)
    dst = jax.random.randint(k_dst, (E,), 0, N)
    etypes = jax.random.randint(k_et, (E,), 0, NUM_RELS)

    # edge norm (E, 1): 1 / in-degree of destination (typical DGL norm)
    deg = jnp.zeros((N,), jnp.float32).at[dst].add(1.0)
    norm = (1.0 / jnp.maximum(deg, 1.0))[dst][:, None]

    gain = 2.0 ** 0.5  # calculate_gain('relu')
    basis = xavier_uniform(k_w, (NUM_BASES, IN_FEAT, OUT_FEAT), gain)
    w_comp = xavier_uniform(k_comp, (NUM_RELS, NUM_BASES), gain)
    # basis composition (matches basis_message_func weight construction)
    weight = jnp.einsum("rb,bio->rio", w_comp, basis)
    loop_lin_w = xavier_uniform(k_loop, (OUT_FEAT, IN_FEAT), gain)  # nn.Linear weight
    loop_w = loop_lin_w.T                                           # applied as feat @ W.T
    bias = jnp.zeros((1, OUT_FEAT), jnp.float32)                    # nn.init.zeros_

    tm, vmem_limit = _tpu_defaults()

    # one-time graph preprocessing (dense, padded, compute-dtype adjacency)
    adj_p = build_relation_adjacency(src, dst, etypes, norm, N, NUM_RELS, tm=tm)

    out = rel_graph_conv(feat, adj_p, weight, loop_w, bias,
                         num_nodes=N, tm=tm, vmem_limit_bytes=vmem_limit)
    out = jax.block_until_ready(out)

    # pure-JAX f32 reference following the PyTorch edge-wise path exactly
    msg = jnp.einsum("ei,eio->eo", feat[src], weight[etypes]) * norm
    ref = jnp.zeros((N, OUT_FEAT), jnp.float32).at[dst].add(msg)
    ref = ref + bias + feat @ loop_w

    # kernel runs the big matmuls with bf16 MXU inputs (f32 accumulation, f32 h for the
    # second pass), so compare with a bf16-appropriate tolerance against the f32 reference.
    err = float(jnp.max(jnp.abs(out - ref)))
    assert jnp.allclose(out, ref, atol=5e-2, rtol=5e-2), err
    print("KERNEL_OK")
</pallas_src>

<mosaic_0001>
module attributes {stable_mosaic.version = 11 : i64} {
  func.func @_rgcn_kernel(%arg0: i32, %arg1: i32, %arg2: memref<1x256x256xbf16, #tpu.memory_space<vmem>>, %arg3: memref<256x128xbf16, #tpu.memory_space<vmem>>, %arg4: memref<3x128x128xbf16, #tpu.memory_space<vmem>>, %arg5: memref<128x128xbf16, #tpu.memory_space<vmem>>, %arg6: memref<1x128xf32, #tpu.memory_space<vmem>>, %arg7: memref<256x128xf32, #tpu.memory_space<vmem>>) attributes {dimension_semantics = [#tpu.dimension_semantics<parallel>, #tpu.dimension_semantics<arbitrary>], iteration_bounds = array<i64: 1, 3>, scalar_prefetch = 0 : i64, scratch_operands = 0 : i64, tpu.core_type = #tpu.core_type<tc>, window_params = [{transform_indices = @transform_0, window_bounds = array<i64: 1, 256, 256>}, {pipeline_mode = #tpu.pipeline_mode<synchronous>, transform_indices = @transform_1, window_bounds = array<i64: 256, 128>}, {pipeline_mode = #tpu.pipeline_mode<synchronous>, transform_indices = @transform_2, window_bounds = array<i64: 3, 128, 128>}, {pipeline_mode = #tpu.pipeline_mode<synchronous>, transform_indices = @transform_3, window_bounds = array<i64: 128, 128>}, {pipeline_mode = #tpu.pipeline_mode<synchronous>, transform_indices = @transform_4, window_bounds = array<i64: 1, 128>}, {transform_indices = @transform_5, window_bounds = array<i64: 256, 128>}]} {
    %c0_i32 = arith.constant 0 : i32
    %0 = arith.cmpi eq, %arg1, %c0_i32 : i32
    %1 = arith.extui %0 : i1 to i32
    %c0_i32_0 = arith.constant 0 : i32
    %2 = arith.cmpi ne, %1, %c0_i32_0 : i32
    scf.if %2 {
      %c256_i32 = arith.constant 256 : i32
      %14 = arith.muli %arg0, %c256_i32 : i32
      %15 = tpu.assume_multiple %14, 256 : i32
      %16 = arith.index_cast %15 : i32 to index
      %c0_12 = arith.constant 0 : index
      %17 = vector.load %arg3[%16, %c0_12] : memref<256x128xbf16, #tpu.memory_space<vmem>>, vector<256x128xbf16>
      %c0_13 = arith.constant 0 : index
      %c0_14 = arith.constant 0 : index
      %18 = vector.load %arg5[%c0_13, %c0_14] : memref<128x128xbf16, #tpu.memory_space<vmem>>, vector<128x128xbf16>
      %cst_15 = arith.constant dense<0.000000e+00> : vector<256x128xf32>
      %19 = tpu.matmul %17, %18, %cst_15 {dimension_numbers = #tpu.dot_dimension_numbers<[1], [0], [0], [1], [0, 0, 1, 1], [], []>} : vector<256x128xbf16>, vector<128x128xbf16>, vector<256x128xf32> -> vector<256x128xf32>
      %c0_16 = arith.constant 0 : index
      %c0_17 = arith.constant 0 : index
      %20 = vector.load %arg6[%c0_16, %c0_17] : memref<1x128xf32, #tpu.memory_space<vmem>>, vector<1x128xf32>
      %21 = vector.broadcast %20 : vector<1x128xf32> to vector<256x128xf32>
      %22 = arith.addf %19, %21 : vector<256x128xf32>
      %c0_18 = arith.constant 0 : index
      %c0_19 = arith.constant 0 : index
      %23 = vector.load %arg7[%c0_18, %c0_19] : memref<256x128xf32, #tpu.memory_space<vmem>>, vector<256x128xf32>
      tpu.vector_store %arg7[%c0_18, %c0_19], %22 {strides = array<i32>} : memref<256x128xf32, #tpu.memory_space<vmem>>, vector<256x128xf32>,
    } else {
    }
    %c0 = arith.constant 0 : index
    %c0_1 = arith.constant 0 : index
    %c0_2 = arith.constant 0 : index
    %3 = vector.load %arg2[%c0, %c0_1, %c0_2] : memref<1x256x256xbf16, #tpu.memory_space<vmem>>, vector<1x256x256xbf16>
    %4 = vector.shape_cast %3 : vector<1x256x256xbf16> to vector<256x256xbf16>
    %c0_3 = arith.constant 0 : index
    %c0_4 = arith.constant 0 : index
    %5 = vector.load %arg3[%c0_3, %c0_4] : memref<256x128xbf16, #tpu.memory_space<vmem>>, vector<256x128xbf16>
    %cst = arith.constant dense<0.000000e+00> : vector<256x128xf32>
    %6 = tpu.matmul %4, %5, %cst {dimension_numbers = #tpu.dot_dimension_numbers<[1], [0], [0], [1], [0, 0, 1, 1], [], []>} : vector<256x256xbf16>, vector<256x128xbf16>, vector<256x128xf32> -> vector<256x128xf32>
    %c0_5 = arith.constant 0 : index
    %c0_6 = arith.constant 0 : index
    %7 = vector.load %arg7[%c0_5, %c0_6] : memref<256x128xf32, #tpu.memory_space<vmem>>, vector<256x128xf32>
    %8 = arith.index_cast %arg1 : i32 to index
    %c0_7 = arith.constant 0 : index
    %c0_8 = arith.constant 0 : index
    %9 = vector.load %arg4[%8, %c0_7, %c0_8] : memref<3x128x128xbf16, #tpu.memory_space<vmem>>, vector<1x128x128xbf16>
    %10 = vector.shape_cast %9 : vector<1x128x128xbf16> to vector<128x128xbf16>
    %cst_9 = arith.constant dense<0.000000e+00> : vector<256x128xf32>
    %11 = tpu.matmul %6, %10, %cst_9 {dimension_numbers = #tpu.dot_dimension_numbers<[1], [0], [0], [1], [0, 0, 1, 1], [], []>} : vector<256x128xf32>, vector<128x128xbf16>, vector<256x128xf32> -> vector<256x128xf32>
    %12 = arith.addf %7, %11 : vector<256x128xf32>
    %c0_10 = arith.constant 0 : index
    %c0_11 = arith.constant 0 : index
    %13 = vector.load %arg7[%c0_10, %c0_11] : memref<256x128xf32, #tpu.memory_space<vmem>>, vector<256x128xf32>
    tpu.vector_store %arg7[%c0_10, %c0_11], %12 {strides = array<i32>} : memref<256x128xf32, #tpu.memory_space<vmem>>, vector<256x128xf32>,
    return
  }
  func.func @transform_0(%arg0: i32, %arg1: i32) -> (i32, i32, i32) {
    %c0_i32 = arith.constant 0 : i32
    %c0_i32_0 = arith.constant 0 : i32
    return %arg1, %arg0, %c0_i32 : i32, i32, i32
  }
  func.func @transform_1(%arg0: i32, %arg1: i32) -> (i32, i32) {
    %c0_i32 = arith.constant 0 : i32
    %c0_i32_0 = arith.constant 0 : i32
    %c0_i32_1 = arith.constant 0 : i32
    return %c0_i32, %c0_i32_0 : i32, i32
  }
  func.func @transform_2(%arg0: i32, %arg1: i32) -> (i32, i32, i32) {
    %c0_i32 = arith.constant 0 : i32
    %c0_i32_0 = arith.constant 0 : i32
    %c0_i32_1 = arith.constant 0 : i32
    %c0_i32_2 = arith.constant 0 : i32
    return %c0_i32, %c0_i32_0, %c0_i32_1 : i32, i32, i32
  }
  func.func @transform_3(%arg0: i32, %arg1: i32) -> (i32, i32) {
    %c0_i32 = arith.constant 0 : i32
    %c0_i32_0 = arith.constant 0 : i32
    %c0_i32_1 = arith.constant 0 : i32
    return %c0_i32, %c0_i32_0 : i32, i32
  }
  func.func @transform_4(%arg0: i32, %arg1: i32) -> (i32, i32) {
    %c0_i32 = arith.constant 0 : i32
    %c0_i32_0 = arith.constant 0 : i32
    %c0_i32_1 = arith.constant 0 : i32
    return %c0_i32, %c0_i32_0 : i32, i32
  }
  func.func @transform_5(%arg0: i32, %arg1: i32) -> (i32, i32) {
    %c0_i32 = arith.constant 0 : i32
    %c0_i32_0 = arith.constant 0 : i32
    return %arg0, %c0_i32 : i32, i32
  }
}

</mosaic_0001>

<bundles_post_ra>
// kernel: rel_graph_conv.1
= control target key start
LH: loop header
LB: loop body
LE: loop exit
PB: predicated region body
PF: predicated region fallthrough
CT: control target
= control target key end

     0   :  { %s2161_s18 = smov 0   ;;  %s2163_s19 = smov 0   ;;  %s2713_s0 = inlined_call_operand.vmem [shape: bf16[3,256,256], index: 0, kind: input, shape index: {}]   ;;  %s2714_s1 = inlined_call_operand.vmem [shape: bf16[256,128], index: 1, kind: input, shape index: {}]   ;;  %s2715_s2 = inlined_call_operand.vmem [shape: bf16[3,128,128], index: 2, kind: input, shape index: {}]   ;;  %s2716_s3 = inlined_call_operand.vmem [shape: bf16[128,128], index: 3, kind: input, shape index: {}]   ;;  %s2717_s4 = inlined_call_operand.vmem [shape: f32[1,128], index: 4, kind: input, shape index: {}]   ;;  %s2718_s5 = inlined_call_operand.vmem [shape: f32[256,128], index: 5, kind: output, shape index: {}]  }
   0x1   :  { %s2165_s20 = smov 0  }
   0x2 LB: > { %s24_s21 = sadd.s32 1, %s2125_s19  ;;  %p1574_p0 = scmp.ge.s32.totalorder %s2129_s20, 1  ;;  %s2129_s20 = sphi %s2165_s20, %s15_s20   ;;  %s2125_s19 = sphi %s2163_s19, %s2720_s19   ;;  %s2121_s18 = sphi %s2161_s18, %s2719_s18  }
   0x3   : > { %p25_p1 = scmp.ge.s32.totalorder %s24_s21, 3  ;;  %p207_p2 = scmp.lt.s32.totalorder %s2129_s20, 4 }
   0x5   : > { %s2722_s21 = smov (%p25_p1, %s24_s21), 0  ;;  %p208_p3 = pnand %p1574_p0, %p207_p2 }
   0x6   : > { %p241_p4 = scmp.lt.s32.totalorder (!%p208_p3), %s2121_s18, 2  ;;  %p1577_p5 = scmp.ne.s32.totalorder (!%p208_p3), %s2121_s18, 0 }
   0x7   : > { %211 = sbr.rel (%p208_p3) target bundleno = 860 (0x35c), region = 40 }
   0xe   : > { %s242_s22 = scalar_select %p241_p4, %s2121_s18, 2 }
   0xf   : > { %261 = sbr.rel (%p1577_p5) target bundleno = 290 (0x122), region = 44  ;;  %v2011_v0 = vld [vmem:[%s2716_s3] sm:$0xff] (!%p1577_p5)   ;;  %v2012_v1 = vld [vmem:[%s2716_s3 + $0x8] sm:$0xff] (!%p1577_p5)   ;;  %v2013_v2 = vld [vmem:[%s2716_s3 + $0x10] sm:$0xff] (!%p1577_p5)  }
  0x10   : > { %s1665_s23 = sshll.u32 %s242_s22, 8  ;;  %1843 = vmatprep.subr.bf16.mxu0 (!%p1577_p5), %v2011_v0  ;;  %1955 = vmatprep.subr.bf16.mxu1 (!%p1577_p5), %v2011_v0  ;;  %v2014_v3 = vld [vmem:[%s2716_s3 + $0x18] sm:$0xff] (!%p1577_p5)   ;;  %v2019_v4 = vld [vmem:[%s2714_s1] sm:$0xff] (!%p1577_p5)   ;;  %v2016_v7 = vld [vmem:[%s2716_s3 + $0x28] sm:$0xff] (!%p1577_p5)  }
  0x11   : > { %s2186_s26 = scalar_lea.vmem %s2713_s0, %s1665_s23  ;;  %1844 = vmatpush3.bf16.msra.mxu0 (!%p1577_p5), %v2011_v0  ;;  %1963 = vmatpush3.bf16.msra.mxu1 (!%p1577_p5), %v2011_v0  ;;  %v2020_v5 = vld [vmem:[%s2714_s1 + $0x40] sm:$0xff] (!%p1577_p5)   ;;  %v2017_v8 = vld [vmem:[%s2716_s3 + $0x30] sm:$0xff] (!%p1577_p5)   ;;  %v2018_v9 = vld [vmem:[%s2716_s3 + $0x38] sm:$0xff] (!%p1577_p5)  }
  0x12   : > { %1845 = vmatprep.subr.bf16.mxu0 (!%p1577_p5), %v2012_v1  ;;  %1956 = vmatprep.subr.bf16.mxu1 (!%p1577_p5), %v2012_v1  ;;  %v2015_v6 = vld [vmem:[%s2716_s3 + $0x20] sm:$0xff] (!%p1577_p5)   ;;  %v2021_v10 = vld [vmem:[%s2714_s1 + $0x8] sm:$0xff] (!%p1577_p5)   ;;  %v2023_v12 = vld [vmem:[%s2714_s1 + $0x10] sm:$0xff] (!%p1577_p5)  }
  0x13   : > { %1859 = vmatprep.mubr.bf16.mxu0 (!%p1577_p5), %v2019_v4  ;;  %1875 = vmatprep.mubr.bf16.mxu1 (!%p1577_p5), %v2020_v5  ;;  %v2022_v11 = vld [vmem:[%s2714_s1 + $0x48] sm:$0xff] (!%p1577_p5)   ;;  %v2024_v13 = vld [vmem:[%s2714_s1 + $0x50] sm:$0xff] (!%p1577_p5)   ;;  %v2025_v14 = vld [vmem:[%s2714_s1 + $0x18] sm:$0xff] (!%p1577_p5)  }
  0x14   : > { %v2026_v15 = vld [vmem:[%s2714_s1 + $0x58] sm:$0xff] (!%p1577_p5)   ;;  %v2027_v16 = vld [vmem:[%s2714_s1 + $0x20] sm:$0xff] (!%p1577_p5)   ;;  %v2029_v18 = vld [vmem:[%s2714_s1 + $0x28] sm:$0xff] (!%p1577_p5)  }
  0x15   : > { %1846 = vmatpush3.bf16.msra.mxu0 (!%p1577_p5), %v2012_v1  ;;  %1964 = vmatpush3.bf16.msra.mxu1 (!%p1577_p5), %v2012_v1  ;;  %v2028_v17 = vld [vmem:[%s2714_s1 + $0x60] sm:$0xff] (!%p1577_p5)   ;;  %v2030_v19 = vld [vmem:[%s2714_s1 + $0x68] sm:$0xff] (!%p1577_p5)   ;;  %v2031_v20 = vld [vmem:[%s2714_s1 + $0x30] sm:$0xff] (!%p1577_p5)  }
  0x16   : > { %1847 = vmatprep.subr.bf16.mxu0 %v2013_v2  ;;  %1957 = vmatprep.subr.bf16.mxu1 %v2013_v2  ;;  %v2032_v21 = vld [vmem:[%s2714_s1 + $0x70] sm:$0xff]   ;;  %v2033_v22 = vld [vmem:[%s2714_s1 + $0x38] sm:$0xff]   ;;  %v2264_v24 = vld [vmem:[%s2717_s4] ss:$0 sm:$0xff] }
  0x17   : > { %v2034_v23 = vld [vmem:[%s2714_s1 + $0x78] sm:$0xff]  }
  0x19   : > { %1848 = vmatpush3.bf16.msra.mxu0 %v2013_v2  ;;  %1965 = vmatpush3.bf16.msra.mxu1 %v2013_v2 }
  0x1a   : > { %1849 = vmatprep.subr.bf16.mxu0 %v2014_v3  ;;  %1958 = vmatprep.subr.bf16.mxu1 %v2014_v3 }
  0x1d   : > { %1850 = vmatpush3.bf16.msra.mxu0 %v2014_v3  ;;  %1966 = vmatpush3.bf16.msra.mxu1 %v2014_v3 }
  0x1e   : > { %1851 = vmatprep.subr.bf16.mxu0 %v2015_v6  ;;  %1959 = vmatprep.subr.bf16.mxu1 %v2015_v6 }
  0x21   : > { %1852 = vmatpush3.bf16.msra.mxu0 %v2015_v6  ;;  %1967 = vmatpush3.bf16.msra.mxu1 %v2015_v6 }
  0x22   : > { %1853 = vmatprep.subr.bf16.mxu0 %v2016_v7  ;;  %1960 = vmatprep.subr.bf16.mxu1 %v2016_v7 }
  0x25   : > { %1854 = vmatpush3.bf16.msra.mxu0 %v2016_v7  ;;  %1968 = vmatpush3.bf16.msra.mxu1 %v2016_v7 }
  0x26   : > { %1855 = vmatprep.subr.bf16.mxu0 %v2017_v8  ;;  %1961 = vmatprep.subr.bf16.mxu1 %v2017_v8 }
  0x29   : > { %1856 = vmatpush3.bf16.msra.mxu0 %v2017_v8  ;;  %1969 = vmatpush3.bf16.msra.mxu1 %v2017_v8 }
  0x2a   : > { %1857 = vmatprep.subr.bf16.mxu0 %v2018_v9  ;;  %1962 = vmatprep.subr.bf16.mxu1 %v2018_v9 }
  0x2d   : > { %1858 = vmatpush3.bf16.msra.mxu0 %v2018_v9  ;;  %1970 = vmatpush3.bf16.msra.mxu1 %v2018_v9 }
  0x30   : > { %1860 = vmatmul.mubr.bf16.vlgmr.msra.gmra.mrb[0].mxu0 %v2021_v10  ;;  %1876 = vmatmul.mubr.bf16.vlgmr.msra.gmra.mrb[0].mxu1 %v2022_v11 }
  0x31   : > { %1863 = vmatprep.mubr.bf16.mxu0 %v2023_v12  ;;  %1879 = vmatprep.mubr.bf16.mxu1 %v2024_v13 }
  0x38   : > { %1864 = vmatmul.mubr.bf16.gmra.mrb[4].mxu0 %v2025_v14  ;;  %1880 = vmatmul.mubr.bf16.gmra.mrb[4].mxu1 %v2026_v15 }
  0x39   : > { %1867 = vmatprep.mubr.bf16.mxu0 %v2027_v16  ;;  %1883 = vmatprep.mubr.bf16.mxu1 %v2028_v17 }
  0x40   : > { %1868 = vmatmul.mubr.bf16.gmra.mrb[8].mxu0 %v2029_v18  ;;  %1884 = vmatmul.mubr.bf16.gmra.mrb[8].mxu1 %v2030_v19 }
  0x41   : > { %1871 = vmatprep.mubr.bf16.mxu0 %v2031_v20  ;;  %1887 = vmatprep.mubr.bf16.mxu1 %v2032_v21 }
  0x48   : > { %1872 = vmatmul.mubr.bf16.gmra.mrb[12].mxu0 %v2033_v22  ;;  %1888 = vmatmul.mubr.bf16.gmra.mrb[12].mxu1 %v2034_v23 }
 0x103   : > { %v1861_v25 = vpop.f32.mrb[0].mxu0  ;;  %v1877_v26 = vpop.f32.mrb[0].mxu1 }
 0x104   : > { %v509_v27 = vadd.f32 %v1861_v25, %v2264_v24  ;;  %v573_v28 = vadd.f32 %v1877_v26, %v2264_v24  ;;  %v500_v29 = vpop.f32.mrb[1].mxu0  ;;  %v564_v30 = vpop.f32.mrb[1].mxu1 }
 0x105   : > { %v501_v31 = vadd.f32 %v2264_v24, %v500_v29  ;;  %v565_v32 = vadd.f32 %v2264_v24, %v564_v30  ;;  %v1862_v33 = vpop.f32.mrb[2].mxu0  ;;  %v1878_v34 = vpop.f32.mrb[2].mxu1 }
 0x106   : > { %629 = vst [vmem:[%s2718_s5 + $0x10] sm:$0xff] %v509_v27  ;;  %645 = vst [vmem:[%s2718_s5 + $0x90] sm:$0xff] %v573_v28  ;;  %v512_v35 = vadd.f32 %v1862_v33, %v2264_v24  ;;  %v576_v36 = vadd.f32 %v1878_v34, %v2264_v24  ;;  %v503_v37 = vpop.f32.mrb[3].mxu0  ;;  %v567_v38 = vpop.f32.mrb[3].mxu1 }
 0x107   : > { %627 = vst [vmem:[%s2718_s5] sm:$0xff] %v501_v31  ;;  %643 = vst [vmem:[%s2718_s5 + $0x80] sm:$0xff] %v565_v32  ;;  %v504_v39 = vadd.f32 %v2264_v24, %v503_v37  ;;  %v568_v40 = vadd.f32 %v2264_v24, %v567_v38 }
 0x108   : > { %630 = vst [vmem:[%s2718_s5 + $0x18] sm:$0xff] %v512_v35  ;;  %646 = vst [vmem:[%s2718_s5 + $0x98] sm:$0xff] %v576_v36 }
 0x109   : > { %628 = vst [vmem:[%s2718_s5 + $0x8] sm:$0xff] %v504_v39  ;;  %644 = vst [vmem:[%s2718_s5 + $0x88] sm:$0xff] %v568_v40 }
 0x10b   : > { %v1865_v41 = vpop.f32.mrb[4].mxu0  ;;  %v1881_v42 = vpop.f32.mrb[4].mxu1 }
 0x10c   : > { %v525_v43 = vadd.f32 %v1865_v41, %v2264_v24  ;;  %v589_v44 = vadd.f32 %v1881_v42, %v2264_v24  ;;  %v516_v45 = vpop.f32.mrb[5].mxu0  ;;  %v580_v46 = vpop.f32.mrb[5].mxu1 }
 0x10d   : > { %v517_v47 = vadd.f32 %v2264_v24, %v516_v45  ;;  %v581_v48 = vadd.f32 %v2264_v24, %v580_v46  ;;  %v1866_v49 = vpop.f32.mrb[6].mxu0  ;;  %v1882_v50 = vpop.f32.mrb[6].mxu1 }
 0x10e   : > { %633 = vst [vmem:[%s2718_s5 + $0x30] sm:$0xff] %v525_v43  ;;  %649 = vst [vmem:[%s2718_s5 + $0xb0] sm:$0xff] %v589_v44  ;;  %v528_v51 = vadd.f32 %v1866_v49, %v2264_v24  ;;  %v592_v52 = vadd.f32 %v1882_v50, %v2264_v24  ;;  %v519_v53 = vpop.f32.mrb[7].mxu0  ;;  %v583_v54 = vpop.f32.mrb[7].mxu1 }
 0x10f   : > { %631 = vst [vmem:[%s2718_s5 + $0x20] sm:$0xff] %v517_v47  ;;  %647 = vst [vmem:[%s2718_s5 + $0xa0] sm:$0xff] %v581_v48  ;;  %v520_v55 = vadd.f32 %v2264_v24, %v519_v53  ;;  %v584_v56 = vadd.f32 %v2264_v24, %v583_v54 }
 0x110   : > { %634 = vst [vmem:[%s2718_s5 + $0x38] sm:$0xff] %v528_v51  ;;  %650 = vst [vmem:[%s2718_s5 + $0xb8] sm:$0xff] %v592_v52 }
 0x111   : > { %632 = vst [vmem:[%s2718_s5 + $0x28] sm:$0xff] %v520_v55  ;;  %648 = vst [vmem:[%s2718_s5 + $0xa8] sm:$0xff] %v584_v56 }
 0x113   : > { %v1869_v57 = vpop.f32.mrb[8].mxu0  ;;  %v1885_v58 = vpop.f32.mrb[8].mxu1 }
 0x114   : > { %v541_v59 = vadd.f32 %v1869_v57, %v2264_v24  ;;  %v605_v60 = vadd.f32 %v1885_v58, %v2264_v24  ;;  %v532_v61 = vpop.f32.mrb[9].mxu0  ;;  %v596_v62 = vpop.f32.mrb[9].mxu1 }
 0x115   : > { %v533_v63 = vadd.f32 %v2264_v24, %v532_v61  ;;  %v597_v0 = vadd.f32 %v2264_v24, %v596_v62  ;;  %v1870_v1 = vpop.f32.mrb[10].mxu0  ;;  %v1886_v2 = vpop.f32.mrb[10].mxu1 }
 0x116   : > { %637 = vst [vmem:[%s2718_s5 + $0x50] sm:$0xff] %v541_v59  ;;  %653 = vst [vmem:[%s2718_s5 + $0xd0] sm:$0xff] %v605_v60  ;;  %v544_v3 = vadd.f32 %v1870_v1, %v2264_v24  ;;  %v608_v4 = vadd.f32 %v1886_v2, %v2264_v24  ;;  %v535_v5 = vpop.f32.mrb[11].mxu0  ;;  %v599_v6 = vpop.f32.mrb[11].mxu1 }
 0x117   : > { %635 = vst [vmem:[%s2718_s5 + $0x40] sm:$0xff] %v533_v63  ;;  %651 = vst [vmem:[%s2718_s5 + $0xc0] sm:$0xff] %v597_v0  ;;  %v536_v7 = vadd.f32 %v2264_v24, %v535_v5  ;;  %v600_v8 = vadd.f32 %v2264_v24, %v599_v6 }
 0x118   : > { %638 = vst [vmem:[%s2718_s5 + $0x58] sm:$0xff] %v544_v3  ;;  %654 = vst [vmem:[%s2718_s5 + $0xd8] sm:$0xff] %v608_v4 }
 0x119   : > { %636 = vst [vmem:[%s2718_s5 + $0x48] sm:$0xff] %v536_v7  ;;  %652 = vst [vmem:[%s2718_s5 + $0xc8] sm:$0xff] %v600_v8 }
 0x11b   : > { %v1873_v9 = vpop.f32.mrb[12].mxu0  ;;  %v1889_v10 = vpop.f32.mrb[12].mxu1 }
 0x11c   : > { %v557_v11 = vadd.f32 %v1873_v9, %v2264_v24  ;;  %v621_v12 = vadd.f32 %v1889_v10, %v2264_v24  ;;  %v548_v13 = vpop.f32.mrb[13].mxu0  ;;  %v612_v14 = vpop.f32.mrb[13].mxu1 }
 0x11d   : > { %v549_v15 = vadd.f32 %v2264_v24, %v548_v13  ;;  %v613_v16 = vadd.f32 %v2264_v24, %v612_v14  ;;  %v1874_v17 = vpop.f32.mrb[14].mxu0  ;;  %v1890_v18 = vpop.f32.mrb[14].mxu1 }
 0x11e   : > { %641 = vst [vmem:[%s2718_s5 + $0x70] sm:$0xff] %v557_v11  ;;  %657 = vst [vmem:[%s2718_s5 + $0xf0] sm:$0xff] %v621_v12  ;;  %v560_v19 = vadd.f32 %v1874_v17, %v2264_v24  ;;  %v624_v20 = vadd.f32 %v1890_v18, %v2264_v24  ;;  %v551_v21 = vpop.f32.mrb[15].mxu0  ;;  %v615_v22 = vpop.f32.mrb[15].mxu1 }
 0x11f   : > { %639 = vst [vmem:[%s2718_s5 + $0x60] sm:$0xff] %v549_v15  ;;  %655 = vst [vmem:[%s2718_s5 + $0xe0] sm:$0xff] %v613_v16  ;;  %v552_v23 = vadd.f32 %v2264_v24, %v551_v21  ;;  %v616_v25 = vadd.f32 %v2264_v24, %v615_v22 }
 0x120   : > { %642 = vst [vmem:[%s2718_s5 + $0x78] sm:$0xff] %v560_v19  ;;  %658 = vst [vmem:[%s2718_s5 + $0xf8] sm:$0xff] %v624_v20 }
 0x121   : > { %640 = vst [vmem:[%s2718_s5 + $0x68] sm:$0xff] %v552_v23  ;;  %656 = vst [vmem:[%s2718_s5 + $0xe8] sm:$0xff] %v616_v25 }
 0x122 PF: > { %v2035_v24 = vld [vmem:[%s2714_s1 + $0x40] sm:$0xff]   ;;  %v2037_v27 = vld [vmem:[%s2714_s1 + $0x48] sm:$0xff]   ;;  %v2039_v29 = vld [vmem:[%s2714_s1 + $0x50] sm:$0xff]   ;;  %s1666_s8 = sshll.u32 %s2121_s18, 6 }
 0x123   : > { %v2036_v26 = vld [vmem:[%s2714_s1] sm:$0xff]   ;;  %1691 = vmatprep.subr.bf16.mxu0 %v2035_v24  ;;  %1971 = vmatprep.subr.bf16.mxu1 %v2035_v24  ;;  %v2038_v28 = vld [vmem:[%s2714_s1 + $0x8] sm:$0xff]   ;;  %v2040_v30 = vld [vmem:[%s2714_s1 + $0x10] sm:$0xff]   ;;  %s2452_s11 = scalar_lea.vmem %s2715_s2, %s1666_s8 }
 0x124   : > { %1692 = vmatpush3.bf16.msra.mxu0 %v2036_v26  ;;  %1979 = vmatpush3.bf16.msra.mxu1 %v2036_v26  ;;  %v2041_v31 = vld [vmem:[%s2714_s1 + $0x58] sm:$0xff]   ;;  %v2043_v33 = vld [vmem:[%s2714_s1 + $0x60] sm:$0xff]   ;;  %v2045_v35 = vld [vmem:[%s2714_s1 + $0x68] sm:$0xff]  }
 0x125   : > { %1693 = vmatprep.subr.bf16.mxu0 %v2037_v27  ;;  %1972 = vmatprep.subr.bf16.mxu1 %v2037_v27  ;;  %v2042_v32 = vld [vmem:[%s2714_s1 + $0x18] sm:$0xff]   ;;  %v2044_v34 = vld [vmem:[%s2714_s1 + $0x20] sm:$0xff]   ;;  %v2046_v37 = vld [vmem:[%s2714_s1 + $0x28] sm:$0xff]  }
 0x126   : > { %v2053_v36 = vld [vmem:[%s2186_s26 + $0x4] ss:$8 sps:$4 sm:$0xff]   ;;  %v2047_v38 = vld [vmem:[%s2714_s1 + $0x70] sm:$0xff]   ;;  %v2049_v40 = vld [vmem:[%s2714_s1 + $0x78] sm:$0xff]  }
 0x127   : > { %1011 = vmatprep.mubr.bf16.mxu0 %v2053_v36  ;;  %v2048_v39 = vld [vmem:[%s2714_s1 + $0x30] sm:$0xff]   ;;  %v2050_v41 = vld [vmem:[%s2714_s1 + $0x38] sm:$0xff]   ;;  %v2051_v42 = vld [vmem:[%s2186_s26] ss:$8 sps:$4 sm:$0xff]  }
 0x128   : > { %1694 = vmatpush3.bf16.msra.mxu0 %v2038_v28  ;;  %1980 = vmatpush3.bf16.msra.mxu1 %v2038_v28  ;;  %v2083_v43 = vld [vmem:[%s2186_s26 + $0xc4] ss:$8 sps:$4 sm:$0xff]   ;;  %v2054_v44 = vld [vmem:[%s2186_s26 + $0x14] ss:$8 sps:$4 sm:$0xff]   ;;  %v2081_v45 = vld [vmem:[%s2186_s26 + $0xc0] ss:$8 sps:$4 sm:$0xff]  }
 0x129   : > { %1695 = vmatprep.subr.bf16.mxu0 %v2039_v29  ;;  %1973 = vmatprep.subr.bf16.mxu1 %v2039_v29  ;;  %v2087_v46 = vld [vmem:[%s2186_s26 + $0xd4] ss:$8 sps:$4 sm:$0xff]   ;;  %v2056_v47 = vld [vmem:[%s2186_s26 + $0x10] ss:$8 sps:$4 sm:$0xff]   ;;  %v2057_v48 = vld [vmem:[%s2186_s26 + $0x24] ss:$8 sps:$4 sm:$0xff]  }
 0x12a   : > { %1107 = vmatprep.mubr.bf16.mxu1 %v2083_v43  ;;  %v2089_v49 = vld [vmem:[%s2186_s26 + $0xd0] ss:$8 sps:$4 sm:$0xff]   ;;  %v2099_v50 = vld [vmem:[%s2452_s11] sm:$0xff]   ;;  %v2100_v51 = vld [vmem:[%s2452_s11 + $0x8] sm:$0xff]  }
 0x12b   : > { %v2093_v52 = vld [vmem:[%s2186_s26 + $0xe4] ss:$8 sps:$4 sm:$0xff]   ;;  %v2101_v53 = vld [vmem:[%s2452_s11 + $0x10] sm:$0xff]   ;;  %v2059_v54 = vld [vmem:[%s2186_s26 + $0x20] ss:$8 sps:$4 sm:$0xff]  }
 0x12c   : > { %1696 = vmatpush3.bf16.msra.mxu0 %v2040_v30  ;;  %1981 = vmatpush3.bf16.msra.mxu1 %v2040_v30  ;;  %v2102_v55 = vld [vmem:[%s2452_s11 + $0x18] sm:$0xff]   ;;  %v2095_v57 = vld [vmem:[%s2186_s26 + $0xe0] ss:$8 sps:$4 sm:$0xff]   ;;  %v2063_v62 = vld [vmem:[%s2186_s26 + $0x44] ss:$8 sps:$4 sm:$0xff]  }
 0x12d   : > { %1697 = vmatprep.subr.bf16.mxu0 %v2041_v31  ;;  %1974 = vmatprep.subr.bf16.mxu1 %v2041_v31  ;;  %v2060_v56 = vld [vmem:[%s2186_s26 + $0x34] ss:$8 sps:$4 sm:$0xff]   ;;  %v2103_v59 = vld [vmem:[%s2452_s11 + $0x20] sm:$0xff]   ;;  %v2062_v60 = vld [vmem:[%s2186_s26 + $0x30] ss:$8 sps:$4 sm:$0xff]  }
 0x12e   : > { %v2096_v58 = vld [vmem:[%s2186_s26 + $0xf4] ss:$8 sps:$4 sm:$0xff]   ;;  %v2104_v61 = vld [vmem:[%s2452_s11 + $0x28] sm:$0xff]   ;;  %v2098_v63 = vld [vmem:[%s2186_s26 + $0xf0] ss:$8 sps:$4 sm:$0xff]  }
 0x12f   : > { %v2105_v0 = vld [vmem:[%s2452_s11 + $0x30] sm:$0xff]   ;;  %v2065_v1 = vld [vmem:[%s2186_s26 + $0x40] ss:$8 sps:$4 sm:$0xff]   ;;  %v2069_v4 = vld [vmem:[%s2186_s26 + $0x64] ss:$8 sps:$4 sm:$0xff]  }
 0x130   : > { %1698 = vmatpush3.bf16.msra.mxu0 %v2042_v32  ;;  %1982 = vmatpush3.bf16.msra.mxu1 %v2042_v32  ;;  %v2066_v2 = vld [vmem:[%s2186_s26 + $0x54] ss:$8 sps:$4 sm:$0xff]   ;;  %v2068_v3 = vld [vmem:[%s2186_s26 + $0x50] ss:$8 sps:$4 sm:$0xff]   ;;  %v2071_v5 = vld [vmem:[%s2186_s26 + $0x60] ss:$8 sps:$4 sm:$0xff]  }
 0x131   : > { %1699 = vmatprep.subr.bf16.mxu0 %v2043_v33  ;;  %1975 = vmatprep.subr.bf16.mxu1 %v2043_v33  ;;  %v2072_v6 = vld [vmem:[%s2186_s26 + $0x74] ss:$8 sps:$4 sm:$0xff]   ;;  %v2074_v7 = vld [vmem:[%s2186_s26 + $0x70] ss:$8 sps:$4 sm:$0xff]   ;;  %v2075_v8 = vld [vmem:[%s2186_s26 + $0x84] ss:$8 sps:$4 sm:$0xff]  }
 0x132   : > { %v2077_v9 = vld [vmem:[%s2186_s26 + $0x80] ss:$8 sps:$4 sm:$0xff]   ;;  %v2078_v10 = vld [vmem:[%s2186_s26 + $0x94] ss:$8 sps:$4 sm:$0xff]   ;;  %v2080_v11 = vld [vmem:[%s2186_s26 + $0x90] ss:$8 sps:$4 sm:$0xff]  }
 0x133   : > { %v2084_v12 = vld [vmem:[%s2186_s26 + $0xa4] ss:$8 sps:$4 sm:$0xff]   ;;  %v2086_v13 = vld [vmem:[%s2186_s26 + $0xa0] ss:$8 sps:$4 sm:$0xff]   ;;  %v2090_v14 = vld [vmem:[%s2186_s26 + $0xb4] ss:$8 sps:$4 sm:$0xff]  }
 0x134   : > { %1700 = vmatpush3.bf16.msra.mxu0 %v2044_v34  ;;  %1983 = vmatpush3.bf16.msra.mxu1 %v2044_v34  ;;  %v2106_v15 = vld [vmem:[%s2452_s11 + $0x38] sm:$0xff]  }
 0x135   : > { %1701 = vmatprep.subr.bf16.mxu0 %v2045_v35  ;;  %1976 = vmatprep.subr.bf16.mxu1 %v2045_v35  ;;  %v2092_v16 = vld [vmem:[%s2186_s26 + $0xb0] ss:$8 sps:$4 sm:$0xff]  }
 0x138   : > { %1702 = vmatpush3.bf16.msra.mxu0 %v2046_v37  ;;  %1984 = vmatpush3.bf16.msra.mxu1 %v2046_v37 }
 0x139   : > { %1703 = vmatprep.subr.bf16.mxu0 %v2047_v38  ;;  %1977 = vmatprep.subr.bf16.mxu1 %v2047_v38 }
 0x13c   : > { %1704 = vmatpush3.bf16.msra.mxu0 %v2048_v39  ;;  %1985 = vmatpush3.bf16.msra.mxu1 %v2048_v39 }
 0x13d   : > { %1705 = vmatprep.subr.bf16.mxu0 %v2049_v40  ;;  %1978 = vmatprep.subr.bf16.mxu1 %v2049_v40 }
 0x140   : > { %1706 = vmatpush3.bf16.msra.mxu0 %v2050_v41  ;;  %1986 = vmatpush3.bf16.msra.mxu1 %v2050_v41 }
 0x141   : > { %1891 = vmatprep.subr.bf16.mxu1 %v2099_v50 }
 0x143   : > { %1012 = vmatmul.mubr.bf16.vlgmr.msra.gmra.mrb[0].mxu0 %v2051_v42  ;;  %1108 = vmatmul.mubr.bf16.vlgmr.msra.gmra.mrb[0].mxu1 %v2081_v45 }
 0x144   : > { %1019 = vmatprep.mubr.bf16.mxu0 %v2054_v44  ;;  %1115 = vmatprep.mubr.bf16.mxu1 %v2087_v46 }
 0x145   : > { %1892 = vmatpush3.bf16.msra.mxu1 %v2099_v50 }
 0x146   : > { %1893 = vmatprep.subr.bf16.mxu1 %v2100_v51 }
 0x149   : > { %1894 = vmatpush3.bf16.msra.mxu1 %v2100_v51 }
 0x14a   : > { %1895 = vmatprep.subr.bf16.mxu1 %v2101_v53 }
 0x14b   : > { %1020 = vmatmul.mubr.bf16.gmra.mrb[4].mxu0 %v2056_v47  ;;  %1116 = vmatmul.mubr.bf16.gmra.mrb[4].mxu1 %v2089_v49 }
 0x14c   : > { %1027 = vmatprep.mubr.bf16.mxu0 %v2057_v48  ;;  %1123 = vmatprep.mubr.bf16.mxu1 %v2093_v52 }
 0x14d   : > { %1896 = vmatpush3.bf16.msra.mxu1 %v2101_v53 }
 0x14e   : > { %1897 = vmatprep.subr.bf16.mxu1 %v2102_v55 }
 0x151   : > { %1898 = vmatpush3.bf16.msra.mxu1 %v2102_v55 }
 0x152   : > { %1899 = vmatprep.subr.bf16.mxu1 %v2103_v59 }
 0x153   : > { %1028 = vmatmul.mubr.bf16.gmra.mrb[8].mxu0 %v2059_v54  ;;  %1124 = vmatmul.mubr.bf16.gmra.mrb[8].mxu1 %v2095_v57 }
 0x154   : > { %1035 = vmatprep.mubr.bf16.mxu0 %v2060_v56  ;;  %1131 = vmatprep.mubr.bf16.mxu1 %v2096_v58 }
 0x155   : > { %1900 = vmatpush3.bf16.msra.mxu1 %v2103_v59 }
 0x156   : > { %1901 = vmatprep.subr.bf16.mxu1 %v2104_v61 }
 0x159   : > { %1902 = vmatpush3.bf16.msra.mxu1 %v2104_v61 }
 0x15a   : > { %1903 = vmatprep.subr.bf16.mxu1 %v2105_v0 }
 0x15b   : > { %1036 = vmatmul.mubr.bf16.gmra.mrb[12].mxu0 %v2062_v60  ;;  %1132 = vmatmul.mubr.bf16.gmra.mrb[12].mxu1 %v2098_v63 }
 0x15c   : > { %1043 = vmatprep.mubr.bf16.mxu0 %v2063_v62 }
 0x15d   : > { %1904 = vmatpush3.bf16.msra.mxu1 %v2105_v0 }
 0x15e   : > { %1905 = vmatprep.subr.bf16.mxu1 %v2106_v15 }
 0x161   : > { %1906 = vmatpush3.bf16.msra.mxu1 %v2106_v15 }
 0x163   : > { %1044 = vmatmul.mubr.bf16.gmra.mrb[16].mxu0 %v2065_v1 }
 0x164   : > { %1051 = vmatprep.mubr.bf16.mxu0 %v2066_v2 }
 0x16b   : > { %1052 = vmatmul.mubr.bf16.gmra.mrb[20].mxu0 %v2068_v3 }
 0x16c   : > { %1059 = vmatprep.mubr.bf16.mxu0 %v2069_v4 }
 0x173   : > { %1060 = vmatmul.mubr.bf16.gmra.mrb[24].mxu0 %v2071_v5 }
 0x174   : > { %1067 = vmatprep.mubr.bf16.mxu0 %v2072_v6 }
 0x17b   : > { %1068 = vmatmul.mubr.bf16.gmra.mrb[28].mxu0 %v2074_v7 }
 0x17c   : > { %1075 = vmatprep.mubr.bf16.mxu0 %v2075_v8 }
 0x183   : > { %1076 = vmatmul.mubr.bf16.gmra.mrb[32].mxu0 %v2077_v9 }
 0x184   : > { %1083 = vmatprep.mubr.bf16.mxu0 %v2078_v10 }
 0x18b   : > { %1084 = vmatmul.mubr.bf16.gmra.mrb[36].mxu0 %v2080_v11 }
 0x18c   : > { %1091 = vmatprep.mubr.bf16.mxu0 %v2084_v12 }
 0x193   : > { %1092 = vmatmul.mubr.bf16.gmra.mrb[40].mxu0 %v2086_v13 }
 0x194   : > { %1099 = vmatprep.mubr.bf16.mxu0 %v2090_v14 }
 0x19b   : > { %1100 = vmatmul.mubr.bf16.gmra.mrb[44].mxu0 %v2092_v16 }
 0x216   : > { %v1707_v17 = vpop.f32.mrb[0].mxu0  ;;  %v1779_v19 = vpop.f32.mrb[0].mxu1 }
 0x217   : > { %v1708_v18 = vpop.f32.mrb[1].mxu0  ;;  %v1780_v22 = vpop.f32.mrb[1].mxu1 }
 0x218   : > { %v1709_v20 = vadd.f32 %v1708_v18, %v1707_v17  ;;  %v1710_v21 = vpop.f32.mrb[2].mxu0  ;;  %v2488_v25 = vadd.f32 %v1780_v22, %v1779_v19  ;;  %v1782_v24 = vpop.f32.mrb[2].mxu1 }
 0x219   : > { %v1711_v23 = vpop.f32.mrb[3].mxu0  ;;  %v1783_v27 = vpop.f32.mrb[3].mxu1 }
 0x21a   : > { %v1712_v26 = vadd.f32 %v1711_v23, %v1710_v21  ;;  %1907 = vmatprep.mubr.f32.mxu1 %v1709_v20  ;;  %v2490_v28 = vadd.f32 %v1783_v27, %v1782_v24 }
 0x21c   : > { %1908 = vmatmul.mubr.f32.vlgmr.msra.gmra.mrb[16].mxu1 %v1712_v26 }
 0x21e   : > { %v1713_v29 = vpop.f32.mrb[4].mxu0  ;;  %v1785_v31 = vpop.f32.mrb[4].mxu1 }
 0x21f   : > { %v1714_v30 = vpop.f32.mrb[5].mxu0  ;;  %v1786_v34 = vpop.f32.mrb[5].mxu1 }
 0x220   : > { %v1715_v32 = vadd.f32 %v1714_v30, %v1713_v29  ;;  %v1716_v33 = vpop.f32.mrb[6].mxu0  ;;  %v2492_v36 = vadd.f32 %v1786_v34, %v1785_v31  ;;  %v1788_v37 = vpop.f32.mrb[6].mxu1 }
 0x221   : > { %v1717_v35 = vpop.f32.mrb[7].mxu0  ;;  %v1789_v39 = vpop.f32.mrb[7].mxu1 }
 0x222   : > { %v1718_v38 = vadd.f32 %v1717_v35, %v1716_v33  ;;  %1910 = vmatprep.mubr.f32.mxu1 %v1715_v32  ;;  %v2494_v40 = vadd.f32 %v1789_v39, %v1788_v37 }
 0x224   : > { %1911 = vmatmul.mubr.f32.gmra.mrb[18].mxu1 %v1718_v38 }
 0x226   : > { %v1719_v41 = vpop.f32.mrb[8].mxu0  ;;  %v1791_v43 = vpop.f32.mrb[8].mxu1 }
 0x227   : > { %v1720_v42 = vpop.f32.mrb[9].mxu0  ;;  %v1792_v46 = vpop.f32.mrb[9].mxu1 }
 0x228   : > { %v1721_v44 = vadd.f32 %v1720_v42, %v1719_v41  ;;  %v1722_v45 = vpop.f32.mrb[10].mxu0  ;;  %v2496_v48 = vadd.f32 %v1792_v46, %v1791_v43  ;;  %v1794_v49 = vpop.f32.mrb[10].mxu1 }
 0x229   : > { %v1723_v47 = vpop.f32.mrb[11].mxu0  ;;  %v1795_v51 = vpop.f32.mrb[11].mxu1 }
 0x22a   : > { %v1724_v50 = vadd.f32 %v1723_v47, %v1722_v45  ;;  %1913 = vmatprep.mubr.f32.mxu1 %v1721_v44  ;;  %v2498_v52 = vadd.f32 %v1795_v51, %v1794_v49 }
 0x22c   : > { %1914 = vmatmul.mubr.f32.gmra.mrb[20].mxu1 %v1724_v50 }
 0x22e   : > { %v1725_v53 = vpop.f32.mrb[12].mxu0  ;;  %v1797_v55 = vpop.f32.mrb[12].mxu1 }
 0x22f   : > { %v1726_v54 = vpop.f32.mrb[13].mxu0  ;;  %v1798_v58 = vpop.f32.mrb[13].mxu1 }
 0x230   : > { %v1727_v56 = vadd.f32 %v1726_v54, %v1725_v53  ;;  %v1728_v57 = vpop.f32.mrb[14].mxu0  ;;  %v2500_v60 = vadd.f32 %v1798_v58, %v1797_v55  ;;  %v1800_v61 = vpop.f32.mrb[14].mxu1  ;;  %v1141_v55 = vld [vmem:[%s2718_s5 + $0x8] sm:$0xff] }
 0x231   : > { %v1729_v59 = vpop.f32.mrb[15].mxu0  ;;  %v1801_v63 = vpop.f32.mrb[15].mxu1 }
 0x232   : > { %v1730_v62 = vadd.f32 %v1729_v59, %v1728_v57  ;;  %1916 = vmatprep.mubr.f32.mxu1 %v1727_v56  ;;  %v2502_v0 = vadd.f32 %v1801_v63, %v1800_v61  ;;  %v1145_v61 = vld [vmem:[%s2718_s5 + $0x28] sm:$0xff] }
 0x234   : > { %1917 = vmatmul.mubr.f32.gmra.mrb[22].mxu1 %v1730_v62  ;;  %v1144_v62 = vld [vmem:[%s2718_s5 + $0x20] sm:$0xff] }
 0x236   : > { %v1731_v1 = vpop.f32.mrb[16].mxu0 }
 0x237   : > { %v1732_v2 = vpop.f32.mrb[17].mxu0 }
 0x238   : > { %v1733_v3 = vadd.f32 %v1732_v2, %v1731_v1  ;;  %v1734_v4 = vpop.f32.mrb[18].mxu0 }
 0x239   : > { %v1735_v5 = vpop.f32.mrb[19].mxu0 }
 0x23a   : > { %v1736_v6 = vadd.f32 %v1735_v5, %v1734_v4  ;;  %1919 = vmatprep.mubr.f32.mxu1 %v1733_v3  ;;  %v1147_v3 = vld [vmem:[%s2718_s5 + $0x38] sm:$0xff]  ;;  %v1146_v4 = vld [vmem:[%s2718_s5 + $0x30] sm:$0xff] }
 0x23c   : > { %1920 = vmatmul.mubr.f32.gmra.mrb[24].mxu1 %v1736_v6 }
 0x23e   : > { %v1737_v7 = vpop.f32.mrb[20].mxu0 }
 0x23f   : > { %v1738_v8 = vpop.f32.mrb[21].mxu0 }
 0x240   : > { %v1739_v9 = vadd.f32 %v1738_v8, %v1737_v7  ;;  %v1740_v10 = vpop.f32.mrb[22].mxu0 }
 0x241   : > { %v1741_v11 = vpop.f32.mrb[23].mxu0 }
 0x242   : > { %v1742_v12 = vadd.f32 %v1741_v11, %v1740_v10  ;;  %1922 = vmatprep.mubr.f32.mxu1 %v1739_v9  ;;  %v1149_v9 = vld [vmem:[%s2718_s5 + $0x48] sm:$0xff]  ;;  %v1148_v10 = vld [vmem:[%s2718_s5 + $0x40] sm:$0xff] }
 0x244   : > { %1923 = vmatmul.mubr.f32.gmra.mrb[26].mxu1 %v1742_v12 }
 0x246   : > { %v1743_v13 = vpop.f32.mrb[24].mxu0 }
 0x247   : > { %v1744_v14 = vpop.f32.mrb[25].mxu0 }
 0x248   : > { %v1745_v15 = vadd.f32 %v1744_v14, %v1743_v13  ;;  %v1746_v16 = vpop.f32.mrb[26].mxu0 }
 0x249   : > { %v1747_v17 = vpop.f32.mrb[27].mxu0 }
 0x24a   : > { %v1748_v18 = vadd.f32 %v1747_v17, %v1746_v16  ;;  %1925 = vmatprep.mubr.f32.mxu1 %v1745_v15  ;;  %v1151_v15 = vld [vmem:[%s2718_s5 + $0x58] sm:$0xff]  ;;  %v1150_v16 = vld [vmem:[%s2718_s5 + $0x50] sm:$0xff] }
 0x24c   : > { %1926 = vmatmul.mubr.f32.gmra.mrb[28].mxu1 %v1748_v18 }
 0x24e   : > { %v1749_v19 = vpop.f32.mrb[28].mxu0 }
 0x24f   : > { %v1750_v20 = vpop.f32.mrb[29].mxu0 }
 0x250   : > { %v1751_v21 = vadd.f32 %v1750_v20, %v1749_v19  ;;  %v1752_v22 = vpop.f32.mrb[30].mxu0 }
 0x251   : > { %v1753_v23 = vpop.f32.mrb[31].mxu0 }
 0x252   : > { %v1754_v24 = vadd.f32 %v1753_v23, %v1752_v22  ;;  %1928 = vmatprep.mubr.f32.mxu1 %v1751_v21  ;;  %v1153_v21 = vld [vmem:[%s2718_s5 + $0x68] sm:$0xff]  ;;  %v1152_v22 = vld [vmem:[%s2718_s5 + $0x60] sm:$0xff] }
 0x254   : > { %1929 = vmatmul.mubr.f32.gmra.mrb[30].mxu1 %v1754_v24 }
 0x256   : > { %v1755_v26 = vpop.f32.mrb[32].mxu0 }
 0x257   : > { %v1756_v27 = vpop.f32.mrb[33].mxu0 }
 0x258   : > { %v1757_v29 = vadd.f32 %v1756_v27, %v1755_v26  ;;  %v1758_v30 = vpop.f32.mrb[34].mxu0 }
 0x259   : > { %v1759_v31 = vpop.f32.mrb[35].mxu0 }
 0x25a   : > { %v1760_v32 = vadd.f32 %v1759_v31, %v1758_v30  ;;  %1931 = vmatprep.mubr.f32.mxu1 %v1757_v29  ;;  %v1155_v29 = vld [vmem:[%s2718_s5 + $0x78] sm:$0xff]  ;;  %v1154_v30 = vld [vmem:[%s2718_s5 + $0x70] sm:$0xff] }
 0x25c   : > { %1932 = vmatmul.mubr.f32.gmra.mrb[32].mxu1 %v1760_v32 }
 0x25e   : > { %v1761_v33 = vpop.f32.mrb[36].mxu0 }
 0x25f   : > { %v1762_v34 = vpop.f32.mrb[37].mxu0 }
 0x260   : > { %v1763_v35 = vadd.f32 %v1762_v34, %v1761_v33  ;;  %v1764_v37 = vpop.f32.mrb[38].mxu0 }
 0x261   : > { %v1765_v38 = vpop.f32.mrb[39].mxu0 }
 0x262   : > { %v1766_v39 = vadd.f32 %v1765_v38, %v1764_v37  ;;  %1934 = vmatprep.mubr.f32.mxu1 %v1763_v35  ;;  %v1157_v35 = vld [vmem:[%s2718_s5 + $0x88] sm:$0xff]  ;;  %v1156_v37 = vld [vmem:[%s2718_s5 + $0x80] sm:$0xff] }
 0x264   : > { %1935 = vmatmul.mubr.f32.gmra.mrb[34].mxu1 %v1766_v39 }
 0x266   : > { %v1767_v41 = vpop.f32.mrb[40].mxu0 }
 0x267   : > { %v1768_v42 = vpop.f32.mrb[41].mxu0 }
 0x268   : > { %v1769_v43 = vadd.f32 %v1768_v42, %v1767_v41  ;;  %v1770_v44 = vpop.f32.mrb[42].mxu0 }
 0x269   : > { %v1771_v45 = vpop.f32.mrb[43].mxu0 }
 0x26a   : > { %v1772_v46 = vadd.f32 %v1771_v45, %v1770_v44  ;;  %1937 = vmatprep.mubr.f32.mxu1 %v1769_v43  ;;  %v1159_v43 = vld [vmem:[%s2718_s5 + $0x98] sm:$0xff]  ;;  %v1158_v44 = vld [vmem:[%s2718_s5 + $0x90] sm:$0xff] }
 0x26c   : > { %1938 = vmatmul.mubr.f32.gmra.mrb[36].mxu1 %v1772_v46 }
 0x26e   : > { %v1773_v47 = vpop.f32.mrb[44].mxu0 }
 0x26f   : > { %v1774_v49 = vpop.f32.mrb[45].mxu0 }
 0x270   : > { %v1775_v50 = vadd.f32 %v1774_v49, %v1773_v47  ;;  %v1776_v51 = vpop.f32.mrb[46].mxu0 }
 0x271   : > { %v1777_v53 = vpop.f32.mrb[47].mxu0 }
 0x272   : > { %v1778_v54 = vadd.f32 %v1777_v53, %v1776_v51  ;;  %1940 = vmatprep.mubr.f32.mxu1 %v1775_v50  ;;  %v1161_v50 = vld [vmem:[%s2718_s5 + $0xa8] sm:$0xff]  ;;  %v1160_v51 = vld [vmem:[%s2718_s5 + $0xa0] sm:$0xff] }
 0x274   : > { %1941 = vmatmul.mubr.f32.gmra.mrb[38].mxu1 %v1778_v54 }
 0x275   : > { %1943 = vmatprep.mubr.f32.mxu1 %v2488_v25  ;;  %v1140_v25 = vld [vmem:[%s2718_s5] sm:$0xff] }
 0x278   : > { %1944 = vmatmul.mubr.f32.gmra.mrb[40].mxu1 %v2490_v28 }
 0x279   : > { %1946 = vmatprep.mubr.f32.mxu1 %v2492_v36 }
 0x27c   : > { %1947 = vmatmul.mubr.f32.gmra.mrb[42].mxu1 %v2494_v40 }
 0x27d   : > { %1949 = vmatprep.mubr.f32.mxu1 %v2496_v48  ;;  %v1143_v48 = vld [vmem:[%s2718_s5 + $0x18] sm:$0xff] }
 0x280   : > { %1950 = vmatmul.mubr.f32.gmra.mrb[44].mxu1 %v2498_v52  ;;  %v1142_v52 = vld [vmem:[%s2718_s5 + $0x10] sm:$0xff] }
 0x281   : > { %1952 = vmatprep.mubr.f32.mxu1 %v2500_v60 }
 0x284   : > { %1953 = vmatmul.mubr.f32.gmra.mrb[46].mxu1 %v2502_v0 }
 0x2ef   : > { %v1909_v28 = vpop.f32.mrb[16].mxu1 }
 0x2f0   : > { %v1433_v36 = vadd.f32 %v1909_v28, %v1141_v55  ;;  %v1273_v56 = vpop.f32.mrb[17].mxu1  ;;  %v1163_v28 = vld [vmem:[%s2718_s5 + $0xb8] sm:$0xff] }
 0x2f1   : > { %v1432_v40 = vadd.f32 %v1273_v56, %v1140_v25 }
 0x2f2   : > { %1465 = vst [vmem:[%s2718_s5 + $0x8] sm:$0xff] %v1433_v36  ;;  %v1162_v36 = vld [vmem:[%s2718_s5 + $0xb0] sm:$0xff] }
 0x2f3   : > { %1464 = vst [vmem:[%s2718_s5] sm:$0xff] %v1432_v40 }
 0x2f7   : > { %v1912_v57 = vpop.f32.mrb[18].mxu1 }
 0x2f8   : > { %v1435_v58 = vadd.f32 %v1912_v57, %v1143_v48  ;;  %v1283_v59 = vpop.f32.mrb[19].mxu1  ;;  %v1165_v57 = vld [vmem:[%s2718_s5 + $0xc8] sm:$0xff] }
 0x2f9   : > { %v1434_v60 = vadd.f32 %v1283_v59, %v1142_v52 }
 0x2fa   : > { %1467 = vst [vmem:[%s2718_s5 + $0x18] sm:$0xff] %v1435_v58  ;;  %v1164_v58 = vld [vmem:[%s2718_s5 + $0xc0] sm:$0xff] }
 0x2fb   : > { %1466 = vst [vmem:[%s2718_s5 + $0x10] sm:$0xff] %v1434_v60 }
 0x2ff   : > { %v1915_v63 = vpop.f32.mrb[20].mxu1 }
 0x300   : > { %v1437_v0 = vadd.f32 %v1915_v63, %v1145_v61  ;;  %v1293_v1 = vpop.f32.mrb[21].mxu1  ;;  %v1167_v63 = vld [vmem:[%s2718_s5 + $0xd8] sm:$0xff] }
 0x301   : > { %v1436_v2 = vadd.f32 %v1293_v1, %v1144_v62 }
 0x302   : > { %1469 = vst [vmem:[%s2718_s5 + $0x28] sm:$0xff] %v1437_v0  ;;  %v1166_v0 = vld [vmem:[%s2718_s5 + $0xd0] sm:$0xff] }
 0x303   : > { %1468 = vst [vmem:[%s2718_s5 + $0x20] sm:$0xff] %v1436_v2 }
 0x307   : > { %v1918_v5 = vpop.f32.mrb[22].mxu1 }
 0x308   : > { %v1439_v6 = vadd.f32 %v1918_v5, %v1147_v3  ;;  %v1303_v7 = vpop.f32.mrb[23].mxu1  ;;  %v1169_v5 = vld [vmem:[%s2718_s5 + $0xe8] sm:$0xff] }
 0x309   : > { %v1438_v8 = vadd.f32 %v1303_v7, %v1146_v4 }
 0x30a   : > { %1471 = vst [vmem:[%s2718_s5 + $0x38] sm:$0xff] %v1439_v6  ;;  %v1168_v6 = vld [vmem:[%s2718_s5 + $0xe0] sm:$0xff] }
 0x30b   : > { %1470 = vst [vmem:[%s2718_s5 + $0x30] sm:$0xff] %v1438_v8 }
 0x30f   : > { %v1921_v11 = vpop.f32.mrb[24].mxu1 }
 0x310   : > { %v1441_v12 = vadd.f32 %v1921_v11, %v1149_v9  ;;  %v1313_v13 = vpop.f32.mrb[25].mxu1  ;;  %v1171_v11 = vld [vmem:[%s2718_s5 + $0xf8] sm:$0xff] }
 0x311   : > { %v1440_v14 = vadd.f32 %v1313_v13, %v1148_v10 }
 0x312   : > { %1473 = vst [vmem:[%s2718_s5 + $0x48] sm:$0xff] %v1441_v12  ;;  %v1170_v12 = vld [vmem:[%s2718_s5 + $0xf0] sm:$0xff] }
 0x313   : > { %1472 = vst [vmem:[%s2718_s5 + $0x40] sm:$0xff] %v1440_v14 }
 0x317   : > { %v1924_v17 = vpop.f32.mrb[26].mxu1 }
 0x318   : > { %v1443_v18 = vadd.f32 %v1924_v17, %v1151_v15  ;;  %v1323_v19 = vpop.f32.mrb[27].mxu1 }
 0x319   : > { %v1442_v20 = vadd.f32 %v1323_v19, %v1150_v16 }
 0x31a   : > { %1475 = vst [vmem:[%s2718_s5 + $0x58] sm:$0xff] %v1443_v18 }
 0x31b   : > { %1474 = vst [vmem:[%s2718_s5 + $0x50] sm:$0xff] %v1442_v20 }
 0x31f   : > { %v1927_v23 = vpop.f32.mrb[28].mxu1 }
 0x320   : > { %v1445_v24 = vadd.f32 %v1927_v23, %v1153_v21  ;;  %v1333_v26 = vpop.f32.mrb[29].mxu1 }
 0x321   : > { %v1444_v27 = vadd.f32 %v1333_v26, %v1152_v22 }
 0x322   : > { %1477 = vst [vmem:[%s2718_s5 + $0x68] sm:$0xff] %v1445_v24 }
 0x323   : > { %1476 = vst [vmem:[%s2718_s5 + $0x60] sm:$0xff] %v1444_v27 }
 0x327   : > { %v1930_v31 = vpop.f32.mrb[30].mxu1 }
 0x328   : > { %v1447_v32 = vadd.f32 %v1930_v31, %v1155_v29  ;;  %v1343_v33 = vpop.f32.mrb[31].mxu1 }
 0x329   : > { %v1446_v34 = vadd.f32 %v1343_v33, %v1154_v30 }
 0x32a   : > { %1479 = vst [vmem:[%s2718_s5 + $0x78] sm:$0xff] %v1447_v32 }
 0x32b   : > { %1478 = vst [vmem:[%s2718_s5 + $0x70] sm:$0xff] %v1446_v34 }
 0x32f   : > { %v1933_v38 = vpop.f32.mrb[32].mxu1 }
 0x330   : > { %v1449_v39 = vadd.f32 %v1933_v38, %v1157_v35  ;;  %v1353_v41 = vpop.f32.mrb[33].mxu1 }
 0x331   : > { %v1448_v42 = vadd.f32 %v1353_v41, %v1156_v37 }
 0x332   : > { %1481 = vst [vmem:[%s2718_s5 + $0x88] sm:$0xff] %v1449_v39 }
 0x333   : > { %1480 = vst [vmem:[%s2718_s5 + $0x80] sm:$0xff] %v1448_v42 }
 0x337   : > { %v1936_v45 = vpop.f32.mrb[34].mxu1 }
 0x338   : > { %v1451_v46 = vadd.f32 %v1936_v45, %v1159_v43  ;;  %v1363_v47 = vpop.f32.mrb[35].mxu1 }
 0x339   : > { %v1450_v49 = vadd.f32 %v1363_v47, %v1158_v44 }
 0x33a   : > { %1483 = vst [vmem:[%s2718_s5 + $0x98] sm:$0xff] %v1451_v46 }
 0x33b   : > { %1482 = vst [vmem:[%s2718_s5 + $0x90] sm:$0xff] %v1450_v49 }
 0x33f   : > { %v1939_v53 = vpop.f32.mrb[36].mxu1 }
 0x340   : > { %v1453_v54 = vadd.f32 %v1939_v53, %v1161_v50  ;;  %v1373_v55 = vpop.f32.mrb[37].mxu1 }
 0x341   : > { %v1452_v25 = vadd.f32 %v1373_v55, %v1160_v51 }
 0x342   : > { %1485 = vst [vmem:[%s2718_s5 + $0xa8] sm:$0xff] %v1453_v54 }
 0x343   : > { %1484 = vst [vmem:[%s2718_s5 + $0xa0] sm:$0xff] %v1452_v25 }
 0x347   : > { %v1942_v56 = vpop.f32.mrb[38].mxu1 }
 0x348   : > { %v1455_v40 = vadd.f32 %v1942_v56, %v1163_v28  ;;  %v1383_v48 = vpop.f32.mrb[39].mxu1 }
 0x349   : > { %v1454_v52 = vadd.f32 %v1383_v48, %v1162_v36 }
 0x34a   : > { %1487 = vst [vmem:[%s2718_s5 + $0xb8] sm:$0xff] %v1455_v40 }
 0x34b   : > { %1486 = vst [vmem:[%s2718_s5 + $0xb0] sm:$0xff] %v1454_v52  ;;  %v1945_v59 = vpop.f32.mrb[40].mxu1 }
 0x34c   : > { %v1457_v60 = vadd.f32 %v1945_v59, %v1165_v57  ;;  %v1393_v61 = vpop.f32.mrb[41].mxu1 }
 0x34d   : > { %v1456_v62 = vadd.f32 %v1393_v61, %v1164_v58 }
 0x34e   : > { %1489 = vst [vmem:[%s2718_s5 + $0xc8] sm:$0xff] %v1457_v60 }
 0x34f   : > { %1488 = vst [vmem:[%s2718_s5 + $0xc0] sm:$0xff] %v1456_v62  ;;  %v1948_v1 = vpop.f32.mrb[42].mxu1 }
 0x350   : > { %v1459_v2 = vadd.f32 %v1948_v1, %v1167_v63  ;;  %v1403_v3 = vpop.f32.mrb[43].mxu1 }
 0x351   : > { %v1458_v4 = vadd.f32 %v1403_v3, %v1166_v0 }
 0x352   : > { %1491 = vst [vmem:[%s2718_s5 + $0xd8] sm:$0xff] %v1459_v2 }
 0x353   : > { %1490 = vst [vmem:[%s2718_s5 + $0xd0] sm:$0xff] %v1458_v4  ;;  %v1951_v7 = vpop.f32.mrb[44].mxu1 }
 0x354   : > { %v1461_v8 = vadd.f32 %v1951_v7, %v1169_v5  ;;  %v1413_v9 = vpop.f32.mrb[45].mxu1 }
 0x355   : > { %v1460_v10 = vadd.f32 %v1413_v9, %v1168_v6 }
 0x356   : > { %1493 = vst [vmem:[%s2718_s5 + $0xe8] sm:$0xff] %v1461_v8 }
 0x357   : > { %1492 = vst [vmem:[%s2718_s5 + $0xe0] sm:$0xff] %v1460_v10  ;;  %v1954_v13 = vpop.f32.mrb[46].mxu1 }
 0x358   : > { %v1463_v14 = vadd.f32 %v1954_v13, %v1171_v11  ;;  %v1423_v15 = vpop.f32.mrb[47].mxu1 }
 0x359   : > { %v1462_v16 = vadd.f32 %v1423_v15, %v1170_v12 }
 0x35a   : > { %1495 = vst [vmem:[%s2718_s5 + $0xf8] sm:$0xff] %v1463_v14 }
 0x35b   : > { %1494 = vst [vmem:[%s2718_s5 + $0xf0] sm:$0xff] %v1462_v16 }
 0x35c PF: > { %s15_s20 = sadd.s32 1, %s2129_s20   ;;  %s2719_s18 = smov %s2125_s19 }
 0x35d   : > { %p12_p6 = scmp.ge.s32.totalorder %s15_s20, 5   ;;  %s2720_s19 = smov %s2722_s21 }
 0x35f   :  { %14 = sbr.rel (!%p12_p6) target bundleno = 2 (0x2), region = 76 }

</bundles_post_ra>
